<compile_context>
chip_gen: v5e
topology: v5e:2x2
jax: 0.10.0
libtpu: 0.0.40
codegen_flags: <defaults>
</compile_context>

<pallas_src>
import functools

import jax
import jax.numpy as jnp
from jax import lax
from jax.experimental import pallas as pl
from jax.experimental.pallas import tpu as pltpu


def _cdiv(a, b):
    return (a + b - 1) // b


def _round_up(x, m):
    return ((x + m - 1) // m) * m


def _neg_pearson_kernel(x_ref, y_ref, o_ref, *scratch,
                        true_t, tile_t, t_tail, row_group, n_rowgroups,
                        n_chunks, unroll, single_sweep):
    """Per-row {sum_x, sum_y, sum_xy, sum_x2, sum_y2} -> per-row Pearson correlation."""
    k = pl.program_id(1)
    n = jnp.float32(true_t)  # true (un-padded) signal length

    # Column-validity masks for the ragged T tail.  Statically, only chunks whose lane range
    # can extend past the valid width of the LAST tile need a mask; for earlier tiles the
    # compare is trivially all-true.  Hoisted out of the row-group loop (loop-invariant).
    lane = lax.broadcasted_iota(jnp.int32, (row_group, 128), 1)
    col_base = k * tile_t
    masks = []
    for c in range(n_chunks):
        if (c + 1) * 128 > t_tail:
            masks.append((col_base + c * 128 + lane) < true_t)
        else:
            masks.append(None)

    def accumulate(rows):
        # 128-lane (one-vreg-wide) static chunks -> pure VPU adds into register accumulators.
        a_sx = jnp.zeros((row_group, 128), jnp.float32)
        a_sy = jnp.zeros((row_group, 128), jnp.float32)
        a_sxy = jnp.zeros((row_group, 128), jnp.float32)
        a_sx2 = jnp.zeros((row_group, 128), jnp.float32)
        a_sy2 = jnp.zeros((row_group, 128), jnp.float32)
        for c in range(n_chunks):
            xc = x_ref[rows, pl.ds(c * 128, 128)].astype(jnp.float32)
            yc = y_ref[rows, pl.ds(c * 128, 128)].astype(jnp.float32)
            if masks[c] is not None:
                xc = jnp.where(masks[c], xc, 0.0)
                yc = jnp.where(masks[c], yc, 0.0)
            a_sx = a_sx + xc
            a_sy = a_sy + yc
            a_sxy = a_sxy + xc * yc
            a_sx2 = a_sx2 + xc * xc
            a_sy2 = a_sy2 + yc * yc
        return a_sx, a_sy, a_sxy, a_sx2, a_sy2

    def pearson_from_partials(sx, sy, sxy, sx2, sy2):
        num = n * sxy - sx * sy
        var_x = n * sx2 - sx * sx
        var_y = n * sy2 - sy * sy
        # rsqrt(vx)*rsqrt(vy) == 1/sqrt(vx*vy), but cannot overflow the f32 product.
        return num * lax.rsqrt(var_x) * lax.rsqrt(var_y)

    if single_sweep:
        # nt == 1: whole signal in one tile -> finalize straight from registers
        # (no VMEM-scratch read-modify-write at all).
        def rowgroup_body(g, carry):
            r0 = pl.multiple_of(g * row_group, row_group)
            rows = pl.ds(r0, row_group)
            a_sx, a_sy, a_sxy, a_sx2, a_sy2 = accumulate(rows)
            o_ref[rows, :] = pearson_from_partials(
                jnp.sum(a_sx, axis=1, keepdims=True),
                jnp.sum(a_sy, axis=1, keepdims=True),
                jnp.sum(a_sxy, axis=1, keepdims=True),
                jnp.sum(a_sx2, axis=1, keepdims=True),
                jnp.sum(a_sy2, axis=1, keepdims=True))
            return carry

        lax.fori_loop(0, n_rowgroups, rowgroup_body, 0, unroll=unroll)
    else:
        sx_ref, sy_ref, sxy_ref, sx2_ref, sy2_ref = scratch
        nt = pl.num_programs(1)

        # ---- init lane-partial accumulators at the start of each reduction sweep ----
        @pl.when(k == 0)
        def _():
            sx_ref[...] = jnp.zeros_like(sx_ref)
            sy_ref[...] = jnp.zeros_like(sy_ref)
            sxy_ref[...] = jnp.zeros_like(sxy_ref)
            sx2_ref[...] = jnp.zeros_like(sx2_ref)
            sy2_ref[...] = jnp.zeros_like(sy2_ref)

        def rowgroup_body(g, carry):
            r0 = pl.multiple_of(g * row_group, row_group)
            rows = pl.ds(r0, row_group)
            a_sx, a_sy, a_sxy, a_sx2, a_sy2 = accumulate(rows)
            # One read-modify-write of the (row_group, 128) lane-partials per row group.
            sx_ref[rows, :] += a_sx
            sy_ref[rows, :] += a_sy
            sxy_ref[rows, :] += a_sxy
            sx2_ref[rows, :] += a_sx2
            sy2_ref[rows, :] += a_sy2
            return carry

        lax.fori_loop(0, n_rowgroups, rowgroup_body, 0, unroll=unroll)

        # ---- finalize once per batch block: single cross-lane (XLU) reduce + EUP rsqrts ----
        @pl.when(k == nt - 1)
        def _():
            o_ref[...] = pearson_from_partials(
                jnp.sum(sx_ref[...], axis=1, keepdims=True),
                jnp.sum(sy_ref[...], axis=1, keepdims=True),
                jnp.sum(sxy_ref[...], axis=1, keepdims=True),
                jnp.sum(sx2_ref[...], axis=1, keepdims=True),
                jnp.sum(sy2_ref[...], axis=1, keepdims=True))


def _neg_pearson_reference(preds, labels):
    # Pure-JAX mirror of the PyTorch forward (also the small-input fast path).
    preds = preds.astype(jnp.float32)
    labels = labels.astype(jnp.float32)
    n = preds.shape[1]
    sum_x = jnp.sum(preds, axis=1)
    sum_y = jnp.sum(labels, axis=1)
    sum_xy = jnp.sum(preds * labels, axis=1)
    sum_x2 = jnp.sum(preds ** 2, axis=1)
    sum_y2 = jnp.sum(labels ** 2, axis=1)
    pearson = (n * sum_xy - sum_x * sum_y) / jnp.sqrt(
        (n * sum_x2 - sum_x ** 2) * (n * sum_y2 - sum_y ** 2))
    return jnp.mean(1.0 - pearson)


def neg_pearson_loss(preds, labels, *, block_b=256, block_t=4096, use_pallas=None):
    """Pallas equivalent of Neg_Pearson.forward(preds, labels) -> scalar loss."""
    assert preds.shape == labels.shape and preds.ndim == 2
    B, T = preds.shape

    if use_pallas is None:
        # For tiny problems pallas_call launch/DMA setup dominates; XLA's fused reduction wins.
        use_pallas = (B * T) >= (1 << 20)
    if not use_pallas:
        return _neg_pearson_reference(preds, labels)

    # Stream inputs in their native dtype (cast to f32 chunk-wise inside the kernel).
    if preds.dtype != labels.dtype or jnp.dtype(preds.dtype).itemsize not in (2, 4):
        preds = preds.astype(jnp.float32)
        labels = labels.astype(jnp.float32)
    itemsize = jnp.dtype(preds.dtype).itemsize
    row_align = 8 if itemsize == 4 else 16   # sublane packing: f32 vs 16-bit dtypes

    # ---- batch (sublane) tiling: minimal implicit padding, no jnp.pad copy ----
    nb = max(1, _cdiv(B, block_b))
    tb = _round_up(_cdiv(B, nb), row_align)
    # v7x megacore: ensure the "parallel" batch axis has >= 2 blocks whenever B allows,
    # otherwise one of the two TensorCores idles.  (No effect on 1-TC v5e/v6e.)
    if _cdiv(B, tb) < 2 and B > row_align:
        tb = _round_up(_cdiv(B, 2), row_align)
    if tb > B:
        # Full-dimension block (exempt from sublane alignment) — never taller than the array.
        tb = B
    nb = _cdiv(B, tb)

    # ---- T (lane / reduction) tiling: innermost grid axis, 128-lane aligned ----
    nt = max(1, _cdiv(T, block_t))
    tt = _round_up(_cdiv(T, nt), 128)
    nt = _cdiv(T, tt)
    t_tail = T - (nt - 1) * tt          # valid columns of the last (possibly ragged) T tile

    row_group = row_align if tb % row_align == 0 else tb
    n_rowgroups = tb // row_group
    n_chunks = tt // 128
    unroll = max(1, min(n_rowgroups, 4 if row_align == 8 else 2))
    single_sweep = nt == 1

    kernel = functools.partial(
        _neg_pearson_kernel,
        true_t=T, tile_t=tt, t_tail=t_tail, row_group=row_group,
        n_rowgroups=n_rowgroups, n_chunks=n_chunks, unroll=unroll,
        single_sweep=single_sweep)

    # Lane-partial accumulators only needed when the T reduction spans several grid steps.
    scratch_shapes = [] if single_sweep else [
        pltpu.VMEM((tb, 128), jnp.float32) for _ in range(5)]

    # VMEM budget: 2 inputs x 2 pipeline buffers x tile + scratch.  Defaults stay well under
    # v7x's 64 MiB/TC; v5e needs the explicit limit (its scoped default is only 16 MiB).
    vmem_bytes = 2 * 2 * tb * tt * itemsize + (0 if single_sweep else 5 * tb * 128 * 4)
    vmem_limit = int(min(96 << 20, max(32 << 20, int(1.25 * vmem_bytes) + (2 << 20))))

    pearson = pl.pallas_call(
        kernel,
        # Allocate nb*tb rows so the last (possibly partial) batch block writes in-bounds;
        # rows >= B are garbage (never mixed with valid rows) and are sliced off below.
        out_shape=jax.ShapeDtypeStruct((nb * tb, 1), jnp.float32),
        grid_spec=pltpu.PrefetchScalarGridSpec(
            num_scalar_prefetch=0,
            grid=(nb, nt),
            in_specs=[
                pl.BlockSpec((tb, tt), lambda i, k: (i, k)),
                pl.BlockSpec((tb, tt), lambda i, k: (i, k)),
            ],
            out_specs=pl.BlockSpec((tb, 1), lambda i, k: (i, 0)),
            scratch_shapes=scratch_shapes,
        ),
        compiler_params=pltpu.CompilerParams(
            dimension_semantics=("parallel", "arbitrary"),
            vmem_limit_bytes=vmem_limit,
        ),
    )(preds, labels)

    # Tiny epilogue: keep only the true batch rows, mean(1 - pearson).
    return jnp.mean(1.0 - pearson[:B, 0])


if __name__ == "__main__":
    key = jax.random.PRNGKey(0)
    k1, k2, k3, k4 = jax.random.split(key, 4)

    # Case 1: f32, aligned shapes, single T sweep (register finalize), 2 batch blocks.
    B, T = 16, 512
    preds = jax.random.normal(k1, (B, T), dtype=jnp.float32)
    labels = 0.7 * preds + 0.3 * jax.random.normal(k2, (B, T), dtype=jnp.float32)
    loss = neg_pearson_loss(preds, labels, use_pallas=True)
    jax.block_until_ready(loss)
    ref = _neg_pearson_reference(preds, labels)
    assert jnp.allclose(loss, ref, rtol=1e-4, atol=1e-5), (loss, ref)

    # Case 2: ragged B and T, multi-step reduction (VMEM-scratch path) with in-kernel
    # masking of the ragged T tail and a partial last batch block — no jnp.pad anywhere.
    B2, T2 = 12, 300
    p2 = jax.random.normal(k3, (B2, T2), dtype=jnp.float32)
    l2 = 0.5 * p2 + 0.5 * jax.random.normal(k1, (B2, T2), dtype=jnp.float32)
    loss2 = neg_pearson_loss(p2, l2, block_b=8, block_t=128, use_pallas=True)
    jax.block_until_ready(loss2)
    ref2 = _neg_pearson_reference(p2, l2)
    assert jnp.allclose(loss2, ref2, rtol=1e-4, atol=1e-5), (loss2, ref2)

    # Case 3: bf16 inputs streamed natively (no wrapper-side f32 upcast), single sweep.
    B3, T3 = 32, 512
    p3 = jax.random.normal(k4, (B3, T3), dtype=jnp.float32)
    l3 = 0.6 * p3 + 0.4 * jax.random.normal(k2, (B3, T3), dtype=jnp.float32)
    p3 = p3.astype(jnp.bfloat16)
    l3 = l3.astype(jnp.bfloat16)
    loss3 = neg_pearson_loss(p3, l3, use_pallas=True)
    jax.block_until_ready(loss3)
    ref3 = _neg_pearson_reference(p3, l3)
    assert jnp.allclose(loss3, ref3, rtol=1e-3, atol=1e-3), (loss3, ref3)

    print("KERNEL_OK")
</pallas_src>

<mosaic_0001>
module attributes {stable_mosaic.version = 11 : i64} {
  func.func @_neg_pearson_kernel(%arg0: i32, %arg1: i32, %arg2: memref<8x512xf32, #tpu.memory_space<vmem>>, %arg3: memref<8x512xf32, #tpu.memory_space<vmem>>, %arg4: memref<8x1xf32, #tpu.memory_space<vmem>>) attributes {dimension_semantics = [#tpu.dimension_semantics<parallel>, #tpu.dimension_semantics<arbitrary>], iteration_bounds = array<i64: 2, 1>, scalar_prefetch = 0 : i64, scratch_operands = 0 : i64, tpu.core_type = #tpu.core_type<tc>, window_params = [{transform_indices = @transform_0, window_bounds = array<i64: 8, 512>}, {transform_indices = @transform_1, window_bounds = array<i64: 8, 512>}, {transform_indices = @transform_2, window_bounds = array<i64: 8, 1>}]} {
    %cst = arith.constant 5.120000e+02 : f32
    %c0_i32 = arith.constant 0 : i32
    %c8_i32 = arith.constant 8 : i32
    %0 = arith.muli %c0_i32, %c8_i32 : i32
    %1 = tpu.assume_multiple %0, 8 : i32
    %cst_0 = arith.constant 0.000000e+00 : f32
    %2 = vector.broadcast %cst_0 : f32 to vector<8x128xf32>
    %cst_1 = arith.constant 0.000000e+00 : f32
    %3 = vector.broadcast %cst_1 : f32 to vector<8x128xf32>
    %cst_2 = arith.constant 0.000000e+00 : f32
    %4 = vector.broadcast %cst_2 : f32 to vector<8x128xf32>
    %cst_3 = arith.constant 0.000000e+00 : f32
    %5 = vector.broadcast %cst_3 : f32 to vector<8x128xf32>
    %cst_4 = arith.constant 0.000000e+00 : f32
    %6 = vector.broadcast %cst_4 : f32 to vector<8x128xf32>
    %7 = arith.index_cast %1 : i32 to index
    %c0 = arith.constant 0 : index
    %8 = vector.load %arg2[%7, %c0] : memref<8x512xf32, #tpu.memory_space<vmem>>, vector<8x128xf32>
    %9 = arith.index_cast %1 : i32 to index
    %c0_5 = arith.constant 0 : index
    %10 = vector.load %arg3[%9, %c0_5] : memref<8x512xf32, #tpu.memory_space<vmem>>, vector<8x128xf32>
    %11 = arith.addf %2, %8 : vector<8x128xf32>
    %12 = arith.addf %3, %10 : vector<8x128xf32>
    %13 = arith.mulf %8, %10 : vector<8x128xf32>
    %14 = arith.addf %4, %13 : vector<8x128xf32>
    %15 = arith.mulf %8, %8 : vector<8x128xf32>
    %16 = arith.addf %5, %15 : vector<8x128xf32>
    %17 = arith.mulf %10, %10 : vector<8x128xf32>
    %18 = arith.addf %6, %17 : vector<8x128xf32>
    %19 = arith.index_cast %1 : i32 to index
    %c128 = arith.constant 128 : index
    %20 = vector.load %arg2[%19, %c128] : memref<8x512xf32, #tpu.memory_space<vmem>>, vector<8x128xf32>
    %21 = arith.index_cast %1 : i32 to index
    %c128_6 = arith.constant 128 : index
    %22 = vector.load %arg3[%21, %c128_6] : memref<8x512xf32, #tpu.memory_space<vmem>>, vector<8x128xf32>
    %23 = arith.addf %11, %20 : vector<8x128xf32>
    %24 = arith.addf %12, %22 : vector<8x128xf32>
    %25 = arith.mulf %20, %22 : vector<8x128xf32>
    %26 = arith.addf %14, %25 : vector<8x128xf32>
    %27 = arith.mulf %20, %20 : vector<8x128xf32>
    %28 = arith.addf %16, %27 : vector<8x128xf32>
    %29 = arith.mulf %22, %22 : vector<8x128xf32>
    %30 = arith.addf %18, %29 : vector<8x128xf32>
    %31 = arith.index_cast %1 : i32 to index
    %c256 = arith.constant 256 : index
    %32 = vector.load %arg2[%31, %c256] : memref<8x512xf32, #tpu.memory_space<vmem>>, vector<8x128xf32>
    %33 = arith.index_cast %1 : i32 to index
    %c256_7 = arith.constant 256 : index
    %34 = vector.load %arg3[%33, %c256_7] : memref<8x512xf32, #tpu.memory_space<vmem>>, vector<8x128xf32>
    %35 = arith.addf %23, %32 : vector<8x128xf32>
    %36 = arith.addf %24, %34 : vector<8x128xf32>
    %37 = arith.mulf %32, %34 : vector<8x128xf32>
    %38 = arith.addf %26, %37 : vector<8x128xf32>
    %39 = arith.mulf %32, %32 : vector<8x128xf32>
    %40 = arith.addf %28, %39 : vector<8x128xf32>
    %41 = arith.mulf %34, %34 : vector<8x128xf32>
    %42 = arith.addf %30, %41 : vector<8x128xf32>
    %43 = arith.index_cast %1 : i32 to index
    %c384 = arith.constant 384 : index
    %44 = vector.load %arg2[%43, %c384] : memref<8x512xf32, #tpu.memory_space<vmem>>, vector<8x128xf32>
    %45 = arith.index_cast %1 : i32 to index
    %c384_8 = arith.constant 384 : index
    %46 = vector.load %arg3[%45, %c384_8] : memref<8x512xf32, #tpu.memory_space<vmem>>, vector<8x128xf32>
    %47 = arith.addf %35, %44 : vector<8x128xf32>
    %48 = arith.addf %36, %46 : vector<8x128xf32>
    %49 = arith.mulf %44, %46 : vector<8x128xf32>
    %50 = arith.addf %38, %49 : vector<8x128xf32>
    %51 = arith.mulf %44, %44 : vector<8x128xf32>
    %52 = arith.addf %40, %51 : vector<8x128xf32>
    %53 = arith.mulf %46, %46 : vector<8x128xf32>
    %54 = arith.addf %42, %53 : vector<8x128xf32>
    %cst_9 = arith.constant dense<0.000000e+00> : vector<8xf32>
    %55 = vector.multi_reduction <add>, %47, %cst_9 [1] : vector<8x128xf32> to vector<8xf32>
    %56 = vector.shape_cast %55 : vector<8xf32> to vector<8x1xf32>
    %cst_10 = arith.constant dense<0.000000e+00> : vector<8xf32>
    %57 = vector.multi_reduction <add>, %48, %cst_10 [1] : vector<8x128xf32> to vector<8xf32>
    %58 = vector.shape_cast %57 : vector<8xf32> to vector<8x1xf32>
    %cst_11 = arith.constant dense<0.000000e+00> : vector<8xf32>
    %59 = vector.multi_reduction <add>, %50, %cst_11 [1] : vector<8x128xf32> to vector<8xf32>
    %60 = vector.shape_cast %59 : vector<8xf32> to vector<8x1xf32>
    %cst_12 = arith.constant dense<0.000000e+00> : vector<8xf32>
    %61 = vector.multi_reduction <add>, %52, %cst_12 [1] : vector<8x128xf32> to vector<8xf32>
    %62 = vector.shape_cast %61 : vector<8xf32> to vector<8x1xf32>
    %cst_13 = arith.constant dense<0.000000e+00> : vector<8xf32>
    %63 = vector.multi_reduction <add>, %54, %cst_13 [1] : vector<8x128xf32> to vector<8xf32>
    %64 = vector.shape_cast %63 : vector<8xf32> to vector<8x1xf32>
    %65 = vector.broadcast %cst : f32 to vector<8x1xf32>
    %66 = arith.mulf %65, %60 : vector<8x1xf32>
    %67 = arith.mulf %56, %58 : vector<8x1xf32>
    %68 = arith.subf %66, %67 : vector<8x1xf32>
    %69 = vector.broadcast %cst : f32 to vector<8x1xf32>
    %70 = arith.mulf %69, %62 : vector<8x1xf32>
    %71 = arith.mulf %56, %56 : vector<8x1xf32>
    %72 = arith.subf %70, %71 : vector<8x1xf32>
    %73 = vector.broadcast %cst : f32 to vector<8x1xf32>
    %74 = arith.mulf %73, %64 : vector<8x1xf32>
    %75 = arith.mulf %58, %58 : vector<8x1xf32>
    %76 = arith.subf %74, %75 : vector<8x1xf32>
    %77 = math.rsqrt %72 : vector<8x1xf32>
    %78 = arith.mulf %68, %77 : vector<8x1xf32>
    %79 = math.rsqrt %76 : vector<8x1xf32>
    %80 = arith.mulf %78, %79 : vector<8x1xf32>
    %81 = arith.index_cast %1 : i32 to index
    %c0_14 = arith.constant 0 : index
    %82 = vector.load %arg4[%81, %c0_14] : memref<8x1xf32, #tpu.memory_space<vmem>>, vector<8x1xf32>
    tpu.vector_store %arg4[%81, %c0_14], %80 {strides = array<i32>} : memref<8x1xf32, #tpu.memory_space<vmem>>, vector<8x1xf32>,
    %c1_i32 = arith.constant 1 : i32
    return
  }
  func.func @transform_0(%arg0: i32, %arg1: i32) -> (i32, i32) {
    %c0_i32 = arith.constant 0 : i32
    return %arg0, %arg1 : i32, i32
  }
  func.func @transform_1(%arg0: i32, %arg1: i32) -> (i32, i32) {
    %c0_i32 = arith.constant 0 : i32
    return %arg0, %arg1 : i32, i32
  }
  func.func @transform_2(%arg0: i32, %arg1: i32) -> (i32, i32) {
    %c0_i32 = arith.constant 0 : i32
    %c0_i32_0 = arith.constant 0 : i32
    return %arg0, %c0_i32 : i32, i32
  }
}

</mosaic_0001>

<bundles_post_ra>
// kernel: tpu_custom_call.1
= control target key start
LH: loop header
LB: loop body
LE: loop exit
PB: predicated region body
PF: predicated region fallthrough
CT: control target
= control target key end

     0   :  { %7 = vsyncpa [#allocation3], 0  ;;  %s719_s0 = inlined_call_operand.hbm [shape: f32[16,512], index: 0, kind: input, shape index: {}]   ;;  %s720_s1 = inlined_call_operand.hbm [shape: f32[16,512], index: 1, kind: input, shape index: {}]   ;;  %s721_s2 = inlined_call_operand.vmem [shape: f32[16,1], index: 2, kind: output, shape index: {}]  }
   0x1   :  { %9 = vsyncpa [#allocation3 + $0x1], 0 }
   0x2   :  { %10 = vsyncpa [#allocation5], 0 }
   0x3   :  { %12 = vsyncpa [#allocation5 + $0x1], 0  ;;  %s624_s9 = smov 0   ;;  %s626_s10 = smov 0  }
   0x4   :  { %s628_s11 = smov 0   ;;  %s630_s12 = smov 0  }
   0x5   :  { %s632_s13 = smov 0   ;;  %s634_s14 = smov 0  }
   0x6 LB: > { %s411_s15 = sadd.s32 4294967295, %s607_s14   ;;  %s30_s16 = sadd.s32 1, %s603_s13  ;;  %s607_s14 = sphi %s634_s14, %s18_s14   ;;  %s603_s13 = sphi %s632_s13, %s728_s13   ;;  %s599_s12 = sphi %s630_s12, %s727_s12   ;;  %s595_s11 = sphi %s628_s11, %s726_s11   ;;  %s591_s10 = sphi %s626_s10, %s725_s10   ;;  %s587_s9 = sphi %s624_s9, %s724_s9  }
   0x7   : > { %p32_p0 = scmp.ge.s32.totalorder %s30_s16, 2  ;;  %s39_s17 = sadd.s32 1, %s595_s11 }
   0x8   : > { %p46_p1 = scmp.ne.s32.totalorder %s595_s11, %s591_s10  ;;  %p47_p2 = scmp.eq.s32.totalorder %s607_s14, 0 }
   0x9   : > { %s730_s16 = smov (%p32_p0, %s30_s16), 0  ;;  %p52_p4 = scmp.ne.s32.totalorder %s591_s10, %s587_s9 }
   0xa   : > { %p660_p3 = por %p47_p2, %p46_p1  ;;  %s34_s19 = ssub.s32 %s603_s13, %s730_s16 }
   0xb   : > { %p53_p5 = scmp.eq.s32.totalorder %s411_s15, 0  ;;  %p37_p6 = scmp.eq.s32.totalorder %s34_s19, 0 }
   0xc   : > { %p440_p8 = scmp.lt.s32.totalorder %s607_s14, 2  ;;  %s130_s22 = sand.u32 1, %s595_s11  }
   0xd   : > { %p667_p7 = por %p53_p5, %p52_p4  ;;  %s427_s23 = sshll.u32 %s603_s13, 5 }
   0xe   : > { %s673_s21 = scalar_select %p37_p6, %s595_s11, %s39_s17  }
   0xf   : > { %s415_s24 = sshll.u32 %s130_s22, 5  ;;  %s141_s27 = scalar_lea.hbm %s719_s0, %s427_s23 }
  0x10   : > { %s143_s28 = sshll.u32 %s141_s27, 4  ;;  %s134_s29 = scalar_lea.vmem [#allocation2], %s415_s24  ;;  %s144_s28 = int_to_ptr.hbm [resolvable:$true] %s143_s28 }
  0x11   : > { %s145_s30 = sshll.u32 %s134_s29, 4  ;;  %p434_p9 = pnand %p440_p8, %p660_p3  ;;  %s146_s30 = int_to_ptr.vmem [resolvable:$true] %s145_s30 }
  0x12   : > { %p421_p10 = scmp.ge.s32.totalorder %s607_s14, 1  ;;  %p172_p11 = scmp.lt.s32.totalorder %s607_s14, 3 }
  0x13   : > { %s131_s3 = scalar_lea.sflag [#allocation3], %s130_s22  ;;  %s163_s6 = scalar_lea.hbm %s720_s1, %s427_s23 }
  0x14   : > { %436 = dma.hbm_to_vmem [thread:$0]  (!%p434_p9), %s144_s28, 512, %s146_s30, %s131_s3  }
  0x15   : > { %p173_p12 = pnand %p421_p10, %p172_p11  ;;  %s165_s7 = sshll.u32 %s163_s6, 4  ;;  %s166_s7 = int_to_ptr.hbm [resolvable:$true] %s165_s7 }
  0x16   : > { %s156_s8 = scalar_lea.vmem [#allocation4], %s415_s24  ;;  %s153_s15 = scalar_lea.sflag [#allocation5], %s130_s22 }
  0x17   : > { %s167_s9 = sshll.u32 %s156_s8, 4  ;;  %176 = sbr.rel (%p173_p12) target bundleno = 191 (0xbf), region = 28  ;;  %s168_s9 = int_to_ptr.vmem [resolvable:$true] %s167_s9 }
  0x18   : > { %439 = dma.hbm_to_vmem [thread:$0]  (!%p434_p9), %s166_s7, 512, %s168_s9, %s153_s15  }
  0x19   : > { %s178_s17 = sand.u32 (!%p173_p12), 1, %s591_s10  }
  0x1a   : > { %s422_s18 = sshll.u32 (!%p173_p12), %s178_s17, 5  ;;  %s179_s19 = scalar_lea.sflag (!%p173_p12), [#allocation3], %s178_s17 }
  0x1b   : > { %s182_s25 = scalar_lea.vmem (!%p173_p12), [#allocation2], %s422_s18 }
  0x1c   : > { %578 = dma.done.wait (%p667_p7), %s179_s19, 512  }
  0x1d   : > { %580 = vsyncadd (%p667_p7), %s179_s19, 4294966784  ;;  %s189_s23 = scalar_lea.sflag [#allocation5], %s178_s17  ;;  %s192_s24 = scalar_lea.vmem [#allocation4], %s422_s18 }
  0x1e   : > { %582 = dma.done.wait (%p667_p7), %s189_s23, 512  }
  0x1f   : > { %584 = vsyncadd (%p667_p7), %s189_s23, 4294966784  ;;  %v230_v0 = vld [vmem:[%s192_s24] sm:$0xff]  ;;  %v240_v1 = vld [vmem:[%s192_s24 + $0x8] sm:$0xff]  ;;  %p220_p13 = scmp.lt.s32.totalorder %s599_s12, 1  ;;  %vm310_vm6 = vcmask 7168  }
  0x20   : > { %v250_v2 = vld [vmem:[%s192_s24 + $0x10] sm:$0xff]  ;;  %v242_v3 = vadd.f32 %v240_v1, %v230_v0  ;;  %v260_v4 = vld [vmem:[%s192_s24 + $0x18] sm:$0xff]  ;;  %v227_v5 = vld [vmem:[%s182_s25] sm:$0xff]  ;;  %v237_v7 = vmul.f32 %v230_v0, %v230_v0  ;;  %v247_v8 = vmul.f32 %v240_v1, %v240_v1 }
  0x21   : > { %v239_v6 = vld [vmem:[%s182_s25 + $0x8] sm:$0xff]  ;;  %v249_v10 = vld [vmem:[%s182_s25 + $0x10] sm:$0xff]  ;;  %v259_v11 = vld [vmem:[%s182_s25 + $0x18] sm:$0xff]  ;;  %v233_v12 = vmul.f32 %v230_v0, %v227_v5  ;;  %v257_v14 = vmul.f32 %v250_v2, %v250_v2  ;;  %v235_v21 = vmul.f32 %v227_v5, %v227_v5  ;;  %v267_v29 = vmul.f32 %v260_v4, %v260_v4  ;;  %s732_s12 = smov (!%p220_p13, %s599_s12), 1 }
  0x22   : > { %v241_v9 = vadd.f32 %v239_v6, %v227_v5  ;;  %v243_v13 = vmul.f32 %v240_v1, %v239_v6  ;;  %v252_v15 = vadd.f32 %v250_v2, %v242_v3  ;;  %v253_v16 = vmul.f32 %v250_v2, %v249_v10  ;;  %s424_s20 = sshll.u32 %s732_s12, 3 }
  0x23   : > { %v263_v17 = vmul.f32 %v260_v4, %v259_v11  ;;  %v248_v18 = vadd.f32 %v247_v8, %v237_v7  ;;  %v245_v22 = vmul.f32 %v239_v6, %v239_v6  ;;  %v255_v24 = vmul.f32 %v249_v10, %v249_v10  ;;  %s223_s27 = scalar_lea.vmem %s721_s2, %s424_s20 }
  0x24   : > { %v251_v19 = vadd.f32 %v249_v10, %v241_v9  ;;  %v244_v20 = vadd.f32 %v243_v13, %v233_v12  ;;  %v262_v23 = vadd.f32 %v260_v4, %v252_v15  ;;  %v265_v32 = vmul.f32 %v259_v11, %v259_v11 }
  0x25   : > { %v246_v27 = vadd.f32 %v245_v22, %v235_v21  ;;  %v258_v28 = vadd.f32 %v257_v14, %v248_v18 }
  0x26   : > { %v261_v25 = vadd.f32 %v259_v11, %v251_v19  ;;  %v254_v26 = vadd.f32 %v253_v16, %v244_v20  ;;  %271 = vadd.xlane.f32.xlu1 %v262_v23 }
  0x27   : > { %v256_v31 = vadd.f32 %v255_v24, %v246_v27  ;;  %v268_v33 = vadd.f32 %v267_v29, %v258_v28 }
  0x28   : > { %269 = vadd.xlane.f32.xlu0 %v261_v25  ;;  %v264_v30 = vadd.f32 %v263_v17, %v254_v26 }
  0x29   : > { %v266_v34 = vadd.f32 %v265_v32, %v256_v31 }
  0x2a   : > { %273 = vadd.xlane.f32.xlu2 %v264_v30 }
  0x2e   : > { %277 = vadd.xlane.f32.xlu1 %v268_v33 }
  0x30   : > { %275 = vadd.xlane.f32.xlu0 %v266_v34 }
  0x99   : > { %v272_v35 = vpop.xlane.xlu1 %271 }
  0x9a   : > { %v286_v38 = vmul.f32 %v272_v35, %v272_v35 }
  0x9b   : > { %v270_v36 = vpop.xlane.xlu0 %269 }
  0x9c   : > { %v283_v41 = vmul.f32 %v270_v36, %v270_v36  ;;  %v280_v57 = vmul.f32 %v272_v35, %v270_v36 }
  0x9d   : > { %v274_v50 = vpop.xlane.xlu2 %273 }
  0x9e   : > { %v279_v54 = vmul.f32 512.0, %v274_v50 }
  0xa0   : > { %v281_v60 = vsub.f32 %v279_v54, %v280_v57 }
  0xa1   : > { %v278_v37 = vpop.xlane.xlu1 %277 }
  0xa2   : > { %v285_v39 = vmul.f32 512.0, %v278_v37 }
  0xa3   : > { %v276_v40 = vpop.xlane.xlu0 %275 }
  0xa4   : > { %v282_v42 = vmul.f32 512.0, %v276_v40  ;;  %v287_v43 = vsub.f32 %v285_v39, %v286_v38 }
  0xa6   : > { %v284_v44 = vsub.f32 %v282_v42, %v283_v41  ;;  %489 = vrsqrt.f32 %v287_v43  ;;  %vm305_vm4 = vweird.f32 %v287_v43 }
  0xa8   : > { %491 = vrsqrt.f32 %v284_v44  ;;  %vm294_vm2 = vweird.f32 %v284_v44 }
  0xac   : > { %v490_v45 = vpop.eup %489 }
  0xad   : > { %v300_v47 = vmul.f32 %v490_v45, %v287_v43  ;;  %vm306_vm1 = vweird.f32 %v490_v45 }
  0xae   : > { %v492_v46 = vpop.eup %491  ;;  %vm307_vm5 = vmor %vm305_vm4, %vm306_vm1 }
  0xaf   : > { %v289_v48 = vmul.f32 %v492_v46, %v284_v44  ;;  %v301_v49 = vmul.f32 %v490_v45, %v300_v47  ;;  %vm295_vm0 = vweird.f32 %v492_v46 }
  0xb0   : > { %vm296_vm3 = vmor %vm294_vm2, %vm295_vm0 }
  0xb1   : > { %v290_v51 = vmul.f32 %v492_v46, %v289_v48  ;;  %v302_v52 = vmul.f32 0.5, %v301_v49 }
  0xb3   : > { %v291_v53 = vmul.f32 0.5, %v290_v51  ;;  %v303_v55 = vsub.f32 1.5, %v302_v52 }
  0xb5   : > { %v292_v56 = vsub.f32 1.5, %v291_v53  ;;  %v304_v58 = vmul.f32 %v490_v45, %v303_v55 }
  0xb7   : > { %v293_v59 = vmul.f32 %v492_v46, %v292_v56  ;;  %v308_v63 = vsel %vm307_vm5, %v490_v45, %v304_v58 }
  0xb9   : > { %v297_v61 = vsel %vm296_vm3, %v492_v46, %v293_v59 }
  0xba   : > { %v298_v62 = vmul.f32 %v297_v61, %v281_v60 }
  0xbc   : > { %v309_v0 = vmul.f32 %v308_v63, %v298_v62 }
  0xbe   : > { %311 = vst.msk [vmem:[%s223_s27] sm:$0xff] %vm310_vm6, %v309_v0 }
  0xbf PF: > { %s18_s14 = sadd.s32 1, %s607_s14   ;;  %s724_s9 = smov %s591_s10 }
  0xc0   : > { %p15_p0 = scmp.ge.s32.totalorder %s18_s14, 4   ;;  %s725_s10 = smov %s595_s11 }
  0xc1   : > { %s726_s11 = smov %s673_s21  ;;  %s727_s12 = smov %s603_s13 }
  0xc2   : > { %s728_s13 = smov %s730_s16  ;;  %17 = sbr.rel (!%p15_p0) target bundleno = 6 (0x6), region = 83 }
  0xc7   :  { %331 = vsyncpa [#allocation3], 1 }
  0xc8   :  { %333 = vsyncpa [#allocation3 + $0x1], 1 }
  0xc9   :  { %334 = vsyncpa [#allocation5], 1 }
  0xca   :  { %336 = vsyncpa [#allocation5 + $0x1], 1 }

</bundles_post_ra>
